<compile_context>
chip_gen: v6e
topology: v6e:2x2x1
jax: 0.10.0
libtpu: 0.0.40
codegen_flags: <defaults>
</compile_context>

<pallas_src>
import functools

import jax
import jax.numpy as jnp
from jax import lax
from jax.experimental import pallas as pl
from jax.experimental.pallas import tpu as pltpu


def _round_up(n, m):
    return ((n + m - 1) // m) * m


def _cdiv(a, b):
    return -(-a // b)


def _mlp_kernel(num_layers, lane_major_out, feat_ref, attr_ref, *refs):
    """refs = (w1_feat, w1_attr, b1, [w2, b2, ...], w_last_row, b_last, out_ref)."""
    out_ref = refs[-1]
    p = refs[:-1]

    w1f, w1a, b1 = p[0], p[1], p[2]

    # ---- layer 1: feature part on the MXU, tiny attribute part on the VPU.
    attr = attr_ref[...].astype(jnp.float32)
    h = b1[...]                                    # (1, H) -> broadcasts below
    for a in range(attr.shape[1]):                 # A rank-1 MACs (A ~ 4)
        h = h + attr[:, a:a + 1] * w1a[a:a + 1, :]
    h = h + jnp.dot(feat_ref[...].astype(jnp.bfloat16), w1f[...],
                    preferred_element_type=jnp.float32)
    h = jnp.maximum(h, 0.0)

    # ---- hidden layers 2 .. num_layers-1 (bf16 MXU, f32 accumulation).
    for layer in range(1, num_layers - 1):
        w = p[1 + 2 * layer]
        b = p[2 + 2 * layer]
        h = jnp.dot(h.astype(jnp.bfloat16), w[...],
                    preferred_element_type=jnp.float32) + b[...]
        h = jnp.maximum(h, 0.0)

    # ---- final Linear(H, 1) in f32.
    wl = p[-2]                                     # (1, H) weight row
    bl = p[-1]                                     # (1, 1) bias
    if lane_major_out:
        # out3[g, 0, b] = sum_h wl[h] * h[g*128+b, h]  -> row scalars on lanes.
        tb, hp = h.shape
        g = tb // 128
        h_g = h.reshape(g, 128, hp)                # layout-preserving split
        wl_b = jnp.broadcast_to(wl[...].reshape(1, 1, hp), (g, 1, hp))
        out3 = lax.dot_general(
            wl_b, h_g, (((2,), (2,)), ((0,), (0,))),
            preferred_element_type=jnp.float32) + bl[...]
        out_ref[...] = out3.reshape(out_ref.shape).astype(out_ref.dtype)
    else:
        col = jnp.sum(h * wl[...], axis=1, keepdims=True) + bl[...]
        out_ref[...] = col.astype(out_ref.dtype)


def prepare_params(params, d_feat, *, lane_pad=128, weight_dtype=jnp.bfloat16):
    """One-time host-side prep of nn.Linear-style params.

    params: list of (W, b), W shape (in, out), b shape (1, out) / (out,).
    Splits W1 into feature / attribute halves (fusing the torch.cat into the
    kernel), zero-pads hidden widths to `lane_pad` lanes, stores hidden
    weights in bf16 (MXU-native), and keeps the attribute path, biases and
    the final Linear in f32.  Zero padding is exactly neutral.
    """
    num_layers = len(params)
    if num_layers < 2:
        raise ValueError("prepare_params expects num_layers >= 2 "
                         "(hidden Linear(+ReLU) layers followed by Linear(H, 1)).")

    hidden_out = [w.shape[1] for w, _ in params[:-1]]
    pad_hidden = [_round_up(d, lane_pad) for d in hidden_out]

    prepped = []

    # Layer 1, split into feature / attribute halves.
    w0, b0 = params[0]
    w0 = jnp.asarray(w0, jnp.float32)
    b0 = jnp.asarray(b0, jnp.float32).reshape(1, -1)
    cp = pad_hidden[0] - w0.shape[1]
    prepped.append(jnp.pad(w0[:d_feat, :], ((0, 0), (0, cp))).astype(weight_dtype))
    prepped.append(jnp.pad(w0[d_feat:, :], ((0, 0), (0, cp))).astype(jnp.float32))
    prepped.append(jnp.pad(b0, ((0, 0), (0, cp))))

    # Middle hidden layers.
    for i in range(1, num_layers - 1):
        w, b = params[i]
        w = jnp.asarray(w, jnp.float32)
        b = jnp.asarray(b, jnp.float32).reshape(1, -1)
        rp = pad_hidden[i - 1] - w.shape[0]
        cp = pad_hidden[i] - w.shape[1]
        prepped.append(jnp.pad(w, ((0, rp), (0, cp))).astype(weight_dtype))
        prepped.append(jnp.pad(b, ((0, 0), (0, cp))))

    # Final Linear(H, 1): stored as an f32 row for the VPU / grouped-MXU path.
    wl, bl = params[-1]
    wl = jnp.asarray(wl, jnp.float32)
    bl = jnp.asarray(bl, jnp.float32).reshape(1, 1)
    rp = pad_hidden[-1] - wl.shape[0]
    prepped.append(jnp.pad(wl, ((0, rp), (0, 0))).T)   # (1, H_pad) f32
    prepped.append(bl)
    return prepped


def _select_tiling(B, max_tile):
    """Even tile count (v7x: 2 TCs), tile rows a multiple of 128, <= max_tile."""
    num_tiles = _cdiv(B, max_tile)
    num_tiles += num_tiles % 2
    num_tiles = max(num_tiles, 2)
    tb = _round_up(_cdiv(B, num_tiles), 128)
    return num_tiles, tb


def prim_discriminator_forward(feature, attribute, prepped, *,
                               small_batch_max=512, max_tile=4096):
    """feature (B, T, C), attribute (B, A), prepped from prepare_params -> (B,)."""
    B = feature.shape[0]
    feat = feature.reshape(B, -1)      # free contiguous row-major reshape
    attr = attribute.reshape(B, -1)
    num_layers = (len(prepped) - 1) // 2
    d_feat, d_attr = feat.shape[1], attr.shape[1]
    hidden = prepped[0].shape[1]

    flops = 2 * B * (d_feat * hidden + d_attr * hidden
                     + max(num_layers - 2, 0) * hidden * hidden + hidden)
    bytes_accessed = (feat.size * feat.dtype.itemsize
                      + attr.size * attr.dtype.itemsize
                      + B * 4
                      + sum(int(p.size) * p.dtype.itemsize for p in prepped))
    cost = pl.CostEstimate(flops=int(flops), transcendentals=0,
                           bytes_accessed=int(bytes_accessed))

    if B <= small_batch_max:
        # Small batch: single gridless invocation, everything VMEM-resident,
        # no pipeline bookkeeping, output stays a (B, 1) column.
        kernel = functools.partial(_mlp_kernel, num_layers, False)
        out = pl.pallas_call(
            kernel,
            out_shape=jax.ShapeDtypeStruct((B, 1), jnp.float32),
            cost_estimate=cost,
        )(feat, attr, *prepped)
        return out.reshape(B)

    # Large batch: even number of >=128-row tiles; weights stay VMEM-resident
    # via a constant index_map; trailing partial block handled by Pallas.
    num_tiles, tb = _select_tiling(B, max_tile)
    groups = tb // 128
    kernel = functools.partial(_mlp_kernel, num_layers, True)
    in_specs = [
        pl.BlockSpec((tb, d_feat), lambda i: (i, 0)),
        pl.BlockSpec((tb, d_attr), lambda i: (i, 0)),
    ] + [pl.BlockSpec(p.shape, lambda i: (0, 0)) for p in prepped]
    out = pl.pallas_call(
        kernel,
        out_shape=jax.ShapeDtypeStruct((num_tiles, groups, 1, 128), jnp.float32),
        grid=(num_tiles,),
        in_specs=in_specs,
        out_specs=pl.BlockSpec((1, groups, 1, 128), lambda i: (i, 0, 0, 0)),
        compiler_params=pltpu.CompilerParams(
            dimension_semantics=("parallel",),
        ),
        cost_estimate=cost,
    )(feat, attr, *prepped)
    # Row-major flatten recovers global row order; drop the tail-pad rows
    # (tiny slice, instead of a wrapper-side jnp.pad of the whole input).
    return out.reshape(-1)[:B]


def make_params(input_dim, num_layers, num_units, key):
    """Deterministic init mirroring PrimDiscriminator.__init__ shapes."""
    params = []
    in_dim = input_dim
    keys = jax.random.split(key, 2 * num_layers)
    for i in range(num_layers - 1):
        w = jax.random.normal(keys[2 * i], (in_dim, num_units), jnp.float32) * 0.1
        b = jax.random.normal(keys[2 * i + 1], (1, num_units), jnp.float32) * 0.1
        params.append((w, b))
        in_dim = num_units
    w = jax.random.normal(keys[-2], (in_dim, 1), jnp.float32) * 0.1
    b = jax.random.normal(keys[-1], (1, 1), jnp.float32) * 0.1
    params.append((w, b))
    return params


def reference_forward(feature, attribute, params):
    """Pure-JAX f32 reference matching the PyTorch forward."""
    B = feature.shape[0]
    x = jnp.concatenate([feature.reshape(B, -1), attribute.reshape(B, -1)], axis=1)
    n = len(params)
    for i, (w, b) in enumerate(params):
        x = x @ w + b
        if i < n - 1:
            x = jnp.maximum(x, 0.0)
    return x[:, 0]


if __name__ == "__main__":
    key = jax.random.PRNGKey(0)
    k_feat, k_attr, k_param, k_feat2, k_attr2 = jax.random.split(key, 5)

    # Small shapes: batch=8, seq=8 x channels=4 -> 32 features, attribute dim=4
    B, T, C, A = 8, 8, 4, 4
    num_layers = 3
    num_units = 32
    input_dim = T * C + A  # 36

    feature = jax.random.normal(k_feat, (B, T, C), jnp.float32)
    attribute = jax.random.normal(k_attr, (B, A), jnp.float32)
    raw_params = make_params(input_dim, num_layers, num_units, k_param)
    prepped = prepare_params(raw_params, d_feat=T * C)

    fwd = jax.jit(prim_discriminator_forward)

    # Path 1: small batch -> gridless single-shot kernel.
    out = jax.block_until_ready(fwd(feature, attribute, prepped))
    ref = reference_forward(feature, attribute, raw_params)
    assert out.shape == (B,), out.shape
    # Tolerance covers the bf16 MXU operands (f32 accumulation).
    assert jnp.allclose(out, ref, atol=5e-2, rtol=5e-2), (out, ref)

    # Path 2: larger batch -> 2 tiles x 384 rows (even tile count for v7x),
    # weights VMEM-resident, lane-major grouped output, no input padding.
    B2 = 600
    feature2 = jax.random.normal(k_feat2, (B2, T, C), jnp.float32)
    attribute2 = jax.random.normal(k_attr2, (B2, A), jnp.float32)
    out2 = jax.block_until_ready(fwd(feature2, attribute2, prepped))
    ref2 = reference_forward(feature2, attribute2, raw_params)
    assert out2.shape == (B2,), out2.shape
    assert jnp.allclose(out2, ref2, atol=5e-2, rtol=5e-2), float(
        jnp.max(jnp.abs(out2 - ref2)))

    print("KERNEL_OK")
</pallas_src>

<mosaic_0001>
module attributes {stable_mosaic.version = 11 : i64} {
  func.func @_mlp_kernel(%arg0: memref<8x32xf32, #tpu.memory_space<vmem>>, %arg1: memref<8x4xf32, #tpu.memory_space<vmem>>, %arg2: memref<32x128xbf16, #tpu.memory_space<vmem>>, %arg3: memref<4x128xf32, #tpu.memory_space<vmem>>, %arg4: memref<1x128xf32, #tpu.memory_space<vmem>>, %arg5: memref<128x128xbf16, #tpu.memory_space<vmem>>, %arg6: memref<1x128xf32, #tpu.memory_space<vmem>>, %arg7: memref<1x128xf32, #tpu.memory_space<vmem>>, %arg8: memref<1x1xf32, #tpu.memory_space<vmem>>, %arg9: memref<8x1xf32, #tpu.memory_space<vmem>>) attributes {dimension_semantics = [], scalar_prefetch = 0 : i64, scratch_operands = 0 : i64, tpu.core_type = #tpu.core_type<tc>} {
    %c0 = arith.constant 0 : index
    %c0_0 = arith.constant 0 : index
    %0 = vector.load %arg1[%c0, %c0_0] : memref<8x4xf32, #tpu.memory_space<vmem>>, vector<8x4xf32>
    %c0_1 = arith.constant 0 : index
    %c0_2 = arith.constant 0 : index
    %1 = vector.load %arg4[%c0_1, %c0_2] : memref<1x128xf32, #tpu.memory_space<vmem>>, vector<1x128xf32>
    %2 = vector.extract_strided_slice %0 {offsets = [0, 0], sizes = [8, 1], strides = [1, 1]} : vector<8x4xf32> to vector<8x1xf32>
    %c0_3 = arith.constant 0 : index
    %c0_4 = arith.constant 0 : index
    %3 = vector.load %arg3[%c0_3, %c0_4] : memref<4x128xf32, #tpu.memory_space<vmem>>, vector<1x128xf32>
    %4 = vector.broadcast %2 : vector<8x1xf32> to vector<8x128xf32>
    %5 = vector.broadcast %3 : vector<1x128xf32> to vector<8x128xf32>
    %6 = arith.mulf %4, %5 : vector<8x128xf32>
    %7 = vector.broadcast %1 : vector<1x128xf32> to vector<8x128xf32>
    %8 = arith.addf %7, %6 : vector<8x128xf32>
    %9 = vector.extract_strided_slice %0 {offsets = [0, 1], sizes = [8, 1], strides = [1, 1]} : vector<8x4xf32> to vector<8x1xf32>
    %c1 = arith.constant 1 : index
    %c0_5 = arith.constant 0 : index
    %10 = vector.load %arg3[%c1, %c0_5] : memref<4x128xf32, #tpu.memory_space<vmem>>, vector<1x128xf32>
    %11 = vector.broadcast %9 : vector<8x1xf32> to vector<8x128xf32>
    %12 = vector.broadcast %10 : vector<1x128xf32> to vector<8x128xf32>
    %13 = arith.mulf %11, %12 : vector<8x128xf32>
    %14 = arith.addf %8, %13 : vector<8x128xf32>
    %15 = vector.extract_strided_slice %0 {offsets = [0, 2], sizes = [8, 1], strides = [1, 1]} : vector<8x4xf32> to vector<8x1xf32>
    %c2 = arith.constant 2 : index
    %c0_6 = arith.constant 0 : index
    %16 = vector.load %arg3[%c2, %c0_6] : memref<4x128xf32, #tpu.memory_space<vmem>>, vector<1x128xf32>
    %17 = vector.broadcast %15 : vector<8x1xf32> to vector<8x128xf32>
    %18 = vector.broadcast %16 : vector<1x128xf32> to vector<8x128xf32>
    %19 = arith.mulf %17, %18 : vector<8x128xf32>
    %20 = arith.addf %14, %19 : vector<8x128xf32>
    %21 = vector.extract_strided_slice %0 {offsets = [0, 3], sizes = [8, 1], strides = [1, 1]} : vector<8x4xf32> to vector<8x1xf32>
    %c3 = arith.constant 3 : index
    %c0_7 = arith.constant 0 : index
    %22 = vector.load %arg3[%c3, %c0_7] : memref<4x128xf32, #tpu.memory_space<vmem>>, vector<1x128xf32>
    %23 = vector.broadcast %21 : vector<8x1xf32> to vector<8x128xf32>
    %24 = vector.broadcast %22 : vector<1x128xf32> to vector<8x128xf32>
    %25 = arith.mulf %23, %24 : vector<8x128xf32>
    %26 = arith.addf %20, %25 : vector<8x128xf32>
    %c0_8 = arith.constant 0 : index
    %c0_9 = arith.constant 0 : index
    %27 = vector.load %arg0[%c0_8, %c0_9] : memref<8x32xf32, #tpu.memory_space<vmem>>, vector<8x32xf32>
    %28 = arith.truncf %27 : vector<8x32xf32> to vector<8x32xbf16>
    %c0_10 = arith.constant 0 : index
    %c0_11 = arith.constant 0 : index
    %29 = vector.load %arg2[%c0_10, %c0_11] : memref<32x128xbf16, #tpu.memory_space<vmem>>, vector<32x128xbf16>
    %cst = arith.constant dense<0.000000e+00> : vector<8x128xf32>
    %30 = tpu.matmul %28, %29, %cst {dimension_numbers = #tpu.dot_dimension_numbers<[1], [0], [0], [1], [0, 0, 1, 1], [], []>} : vector<8x32xbf16>, vector<32x128xbf16>, vector<8x128xf32> -> vector<8x128xf32>
    %31 = arith.addf %26, %30 : vector<8x128xf32>
    %cst_12 = arith.constant 0.000000e+00 : f32
    %32 = vector.broadcast %cst_12 : f32 to vector<8x128xf32>
    %33 = arith.maximumf %31, %32 : vector<8x128xf32>
    %34 = arith.truncf %33 : vector<8x128xf32> to vector<8x128xbf16>
    %c0_13 = arith.constant 0 : index
    %c0_14 = arith.constant 0 : index
    %35 = vector.load %arg5[%c0_13, %c0_14] : memref<128x128xbf16, #tpu.memory_space<vmem>>, vector<128x128xbf16>
    %cst_15 = arith.constant dense<0.000000e+00> : vector<8x128xf32>
    %36 = tpu.matmul %34, %35, %cst_15 {dimension_numbers = #tpu.dot_dimension_numbers<[1], [0], [0], [1], [0, 0, 1, 1], [], []>} : vector<8x128xbf16>, vector<128x128xbf16>, vector<8x128xf32> -> vector<8x128xf32>
    %c0_16 = arith.constant 0 : index
    %c0_17 = arith.constant 0 : index
    %37 = vector.load %arg6[%c0_16, %c0_17] : memref<1x128xf32, #tpu.memory_space<vmem>>, vector<1x128xf32>
    %38 = vector.broadcast %37 : vector<1x128xf32> to vector<8x128xf32>
    %39 = arith.addf %36, %38 : vector<8x128xf32>
    %cst_18 = arith.constant 0.000000e+00 : f32
    %40 = vector.broadcast %cst_18 : f32 to vector<8x128xf32>
    %41 = arith.maximumf %39, %40 : vector<8x128xf32>
    %c0_19 = arith.constant 0 : index
    %c0_20 = arith.constant 0 : index
    %42 = vector.load %arg7[%c0_19, %c0_20] : memref<1x128xf32, #tpu.memory_space<vmem>>, vector<1x128xf32>
    %43 = vector.broadcast %42 : vector<1x128xf32> to vector<8x128xf32>
    %44 = arith.mulf %41, %43 : vector<8x128xf32>
    %cst_21 = arith.constant dense<0.000000e+00> : vector<8xf32>
    %45 = vector.multi_reduction <add>, %44, %cst_21 [1] : vector<8x128xf32> to vector<8xf32>
    %46 = vector.shape_cast %45 : vector<8xf32> to vector<8x1xf32>
    %c0_22 = arith.constant 0 : index
    %c0_23 = arith.constant 0 : index
    %47 = vector.load %arg8[%c0_22, %c0_23] : memref<1x1xf32, #tpu.memory_space<vmem>>, vector<1x1xf32>
    %48 = vector.broadcast %47 : vector<1x1xf32> to vector<8x1xf32>
    %49 = arith.addf %46, %48 : vector<8x1xf32>
    %c0_24 = arith.constant 0 : index
    %c0_25 = arith.constant 0 : index
    %50 = vector.load %arg9[%c0_24, %c0_25] : memref<8x1xf32, #tpu.memory_space<vmem>>, vector<8x1xf32>
    tpu.vector_store %arg9[%c0_24, %c0_25], %49 {strides = array<i32>} : memref<8x1xf32, #tpu.memory_space<vmem>>, vector<8x1xf32>,
    return
  }
}

</mosaic_0001>

<bundles_post_ra>
// kernel: prim_discriminator_forward.1
= control target key start
LH: loop header
LB: loop body
LE: loop exit
PB: predicated region body
PF: predicated region fallthrough
CT: control target
= control target key end

     0   :  { %v369_v0 = vmov 0.0   ;;  %vm370_vm0 = vmmov 0   ;;  %v371_v3 = vmov 0   ;;  %v372_v4 = vmov 2   ;;  %s490_s2 = inlined_call_operand.vmem [shape: bf16[32,128], index: 2, kind: input, shape index: {}]   ;;  %s491_s0 = inlined_call_operand.vmem [shape: f32[8,32], index: 0, kind: input, shape index: {}]   ;;  %s492_s1 = inlined_call_operand.vmem [shape: f32[8,4], index: 1, kind: input, shape index: {}]   ;;  %s493_s5 = inlined_call_operand.vmem [shape: bf16[128,128], index: 5, kind: input, shape index: {}]   ;;  %s494_s3 = inlined_call_operand.vmem [shape: f32[4,128], index: 3, kind: input, shape index: {}]   ;;  %s495_s4 = inlined_call_operand.vmem [shape: f32[1,128], index: 4, kind: input, shape index: {}]   ;;  %s496_s8 = inlined_call_operand.<no memory space> [shape: f32[1,1], index: 8, kind: input, shape index: {}]   ;;  %s497_s6 = inlined_call_operand.vmem [shape: f32[1,128], index: 6, kind: input, shape index: {}]   ;;  %s498_s7 = inlined_call_operand.vmem [shape: f32[1,128], index: 7, kind: input, shape index: {}]   ;;  %s499_s9 = inlined_call_operand.vmem [shape: f32[8,1], index: 9, kind: output, shape index: {}]  }
   0x1   :  { %320 = vmatprep.subr.bf16.mxu0 %v369_v0  ;;  %v359_v1 = vld [vmem:[%s490_s2 + $0x8] sm:$0xff]   ;;  %324 = vmatprep.mubr.msk.bf16.mxu0 %vm370_vm0, %v369_v0  ;;  %v360_v2 = vld [vmem:[%s490_s2] sm:$0xff]   ;;  %v361_v7 = vld [vmem:[%s493_s5 + $0x38] sm:$0xff]   ;;  %vm106_vm1 = vcmask 261120   ;;  %v373_v10 = vmov 1   ;;  %v374_v11 = vmov 3   ;;  %v14_v42 = vstv %s496_s8 }
   0x2   :  { %354 = vset.pattern.permute.xlu0 %v371_v3  ;;  %356 = vset.pattern.permute.xlu1 %v372_v4  ;;  %v88_v5 = vld [vmem:[%s491_s0] sm:$0xff]  ;;  %v362_v9 = vld [vmem:[%s493_s5 + $0x30] sm:$0xff]   ;;  %v363_v12 = vld [vmem:[%s493_s5 + $0x28] sm:$0xff]   ;;  %15 = vst [vmem:[#allocation2] sm:$0x1] %v14_v42  ;;  %vm283_vm2 = vcmask 7168  }
   0x3   :  { %321 = vmatpush3.bf16.msra.mxu0 %v359_v1  ;;  %v35_v6 = vld [vmem:[%s492_s1] sm:$0xff]  ;;  %328 = vmatprep.subr.bf16.mxu1 %v369_v0  ;;  %v89_v8 = vpack.c.bf16 %v88_v5, %v88_v5  ;;  %v365_v14 = vld [vmem:[%s493_s5 + $0x18] sm:$0xff]   ;;  %v366_v15 = vld [vmem:[%s493_s5 + $0x10] sm:$0xff]  }
   0x4   :  { %322 = vmatprep.subr.bf16.mxu0 %v369_v0  ;;  %40 = vperm.xlu0 %354, %v35_v6   ;;  %v364_v13 = vld [vmem:[%s493_s5 + $0x20] sm:$0xff]   ;;  %v367_v16 = vld [vmem:[%s493_s5 + $0x8] sm:$0xff]  }
   0x5   :  { %68 = vperm.xlu1 %356, %v35_v6   ;;  %344 = vmatprep.mubr.msk.bf16.mxu1 %vm370_vm0, %v369_v0  ;;  %v368_v17 = vld [vmem:[%s493_s5] sm:$0xff]  }
   0x6   :  { %329 = vmatpush3.bf16.msra.mxu1 %v361_v7  ;;  %v289_v19 = vld [vmem:[%s494_s3] ss:$0 sm:$0xff]  ;;  %v291_v22 = vld [vmem:[%s494_s3 + $0x1] ss:$0 sm:$0xff]  ;;  %v292_v27 = vld [vmem:[%s494_s3 + $0x2] ss:$0 sm:$0xff] }
   0x7   :  { %323 = vmatpush3.bf16.msra.mxu0 %v360_v2  ;;  %330 = vmatprep.subr.bf16.mxu1 %v369_v0  ;;  %v290_v21 = vld [vmem:[%s495_s4] ss:$0 sm:$0xff]  ;;  %v293_v30 = vld [vmem:[%s494_s3 + $0x3] ss:$0 sm:$0xff] }
   0x8   :  { %355 = vset.pattern.permute.xlu0 %v373_v10  ;;  %v297_v43 = vld [vmem:[%s497_s6] ss:$0 sm:$0xff] }
   0x9   :  { %57 = vperm.xlu0 %355, %v35_v6   ;;  %357 = vset.pattern.permute.xlu1 %v374_v11  ;;  %v306_v47 = vld [vmem:[%s498_s7] ss:$0 sm:$0xff] }
   0xa   :  { %325 = vmatmul.mubr.msk.bf16.vlgmr.msra.gmra.mxu0 %vm106_vm1, %v89_v8  ;;  %79 = vperm.xlu1 %357, %v35_v6   ;;  %v307_v52 = vld [vmem:[#allocation2] ss:$0 sm:$0xff] }
   0xb   :  { %331 = vmatpush3.bf16.msra.mxu1 %v362_v9 }
   0xc   :  { %332 = vmatprep.subr.bf16.mxu1 %v369_v0 }
   0xd   :  { %358 = vset.pattern.permute.xlu0 %v374_v11 }
   0xf   :  { %333 = vmatpush3.bf16.msra.mxu1 %v363_v12 }
  0x10   :  { %334 = vmatprep.subr.bf16.mxu1 %v369_v0 }
  0x13   :  { %335 = vmatpush3.bf16.msra.mxu1 %v364_v13 }
  0x14   :  { %336 = vmatprep.subr.bf16.mxu1 %v369_v0 }
  0x17   :  { %337 = vmatpush3.bf16.msra.mxu1 %v365_v14 }
  0x18   :  { %338 = vmatprep.subr.bf16.mxu1 %v369_v0 }
  0x1b   :  { %339 = vmatpush3.bf16.msra.mxu1 %v366_v15 }
  0x1c   :  { %340 = vmatprep.subr.bf16.mxu1 %v369_v0 }
  0x1f   :  { %341 = vmatpush3.bf16.msra.mxu1 %v367_v16 }
  0x20   :  { %342 = vmatprep.subr.bf16.mxu1 %v369_v0 }
  0x23   :  { %343 = vmatpush3.bf16.msra.mxu1 %v368_v17 }
  0x7f   :  { %v41_v18 = vpop.permute.xlu0 %40 }
  0x80   :  { %v47_v20 = vmul.f32 %v289_v19, %v41_v18  ;;  %v69_v24 = vpop.permute.xlu1 %68 }
  0x81   :  { %v75_v28 = vmul.f32 %v292_v27, %v69_v24 }
  0x82   :  { %v54_v25 = vadd.f32 %v290_v21, %v47_v20 }
  0x84   :  { %v58_v23 = vpop.permute.xlu0 %57 }
  0x85   :  { %v64_v26 = vmul.f32 %v291_v22, %v58_v23  ;;  %v80_v31 = vpop.permute.xlu1 %79 }
  0x86   :  { %v86_v32 = vmul.f32 %v293_v30, %v80_v31 }
  0x87   :  { %v65_v29 = vadd.f32 %v64_v26, %v54_v25 }
  0x89   :  { %v76_v33 = vadd.f32 %v75_v28, %v65_v29 }
  0x8b   :  { %v87_v34 = vadd.f32 %v86_v32, %v76_v33 }
  0xca   :  { %v144_v35 = vpop.f32.mrf.mxu0 }
  0xcb   :  { %v150_v36 = vadd.f32 %v144_v35, %v87_v34 }
  0xcc   :  { %v326_v37 = vpop.f32.mrf.mxu0 }
  0xcd   :  { %v151_v38 = vmax.f32 %v150_v36, 0.0 }
  0xce   :  { %v147_v39 = vpop.f32.mrf.mxu0 }
  0xcf   :  { %v152_v40 = vpack.c.bf16 %v151_v38, %v151_v38 }
  0xd0   :  { %v327_v41 = vpop.f32.mrf.mxu0 }
  0xd1   :  { %345 = vmatmul.mubr.bf16.vlgmr.msra.gmra.mxu1 %v152_v40 }
 0x191   :  { %v258_v44 = vpop.f32.mrf.mxu1 }
 0x192   :  { %v259_v45 = vadd.f32 %v297_v43, %v258_v44 }
 0x193   :  { %v346_v46 = vpop.f32.mrf.mxu1 }
 0x194   :  { %v264_v48 = vmax.f32 %v259_v45, 0.0 }
 0x195   :  { %v261_v49 = vpop.f32.mrf.mxu1 }
 0x196   :  { %v272_v50 = vmul.f32 %v306_v47, %v264_v48 }
 0x197   :  { %v347_v51 = vpop.f32.mrf.mxu1 }
 0x198   :  { %273 = vadd.xlane.f32.xlu1 %v272_v50 }
 0x221   :  { %v274_v53 = vpop.xlane.xlu1 %273 }
 0x222   :  { %v282_v54 = vadd.f32 %v307_v52, %v274_v53 }
 0x224   :  { %284 = vst.msk [vmem:[%s499_s9] sm:$0xff] %vm283_vm2, %v282_v54 }

</bundles_post_ra>
